<compile_context>
chip_gen: v5e
topology: v5e:2x2
jax: 0.10.0
libtpu: 0.0.40
codegen_flags: <defaults>
</compile_context>

<pallas_src>
import math
from functools import partial

import jax
import jax.numpy as jnp
from jax import lax
from jax.experimental import pallas as pl
from jax.experimental.pallas import tpu as pltpu

_INV_SQRT2 = 0.7071067811865476

# Contract the last dim of both operands:  A[m, k] x B[n, k] -> [m, n].
# Lets the kernel use nn.Linear's [out, in] weight layout with no transpose.
_CONTRACT_LAST = (((1,), (1,)), ((), ()))


def _query_vmem_capacity():
    try:
        info = pltpu.get_tpu_info()
        cap = getattr(info, "vmem_capacity_bytes", None)
        if cap:
            return int(min(max(int(cap), 32 << 20), 128 << 20))
    except Exception:
        pass
    return 64 << 20  # conservative default: v7x per-TensorCore VMEM


_VMEM_CAP_BYTES = _query_vmem_capacity()
_DEFAULT_BUDGET = int(_VMEM_CAP_BYTES * 0.8)


def _round_up(n, m):
    return -(-n // m) * m


def _gelu_exact_f32(u):
    # Exact-erf GELU (matches torch.erf); multiply by 1/sqrt(2), not divide.
    return u * 0.5 * (1.0 + lax.erf(u * _INV_SQRT2))


# --------------------------------------------------------------------------
# Kernels
# --------------------------------------------------------------------------
def ffn_kernel_resident(x_ref, w1_ref, b1_ref, w2_ref, b2_ref, o_ref):
    # x_ref: (tm, H)   w1_ref: (F, H)  b1_ref: (1, F)
    # w2_ref: (H, F)   b2_ref: (1, H)  o_ref: (tm, H)
    inter = lax.dot_general(x_ref[...], w1_ref[...], _CONTRACT_LAST,
                            preferred_element_type=jnp.float32)
    inter = _gelu_exact_f32(inter + b1_ref[...].astype(jnp.float32))
    out = lax.dot_general(inter.astype(w2_ref.dtype), w2_ref[...], _CONTRACT_LAST,
                          preferred_element_type=jnp.float32)
    o_ref[...] = (out + b2_ref[...].astype(jnp.float32)).astype(o_ref.dtype)


def ffn_kernel_tiled(x_ref, w1_ref, b1_ref, w2_ref, b2_ref, o_ref, acc_ref):
    # x_ref: (tm, H)   w1_ref: (tf, H)  b1_ref: (1, tf)
    # w2_ref: (H, tf)  b2_ref: (1, H)   o_ref: (tm, H)  acc_ref: (tm, H) f32
    f = pl.program_id(1)

    @pl.when(f == 0)
    def _():
        acc_ref[...] = jnp.zeros_like(acc_ref)

    inter = lax.dot_general(x_ref[...], w1_ref[...], _CONTRACT_LAST,
                            preferred_element_type=jnp.float32)
    inter = _gelu_exact_f32(inter + b1_ref[...].astype(jnp.float32))
    acc_ref[...] += lax.dot_general(inter.astype(w2_ref.dtype), w2_ref[...],
                                    _CONTRACT_LAST,
                                    preferred_element_type=jnp.float32)

    @pl.when(f == pl.num_programs(1) - 1)
    def _():
        o_ref[...] = (acc_ref[...] + b2_ref[...].astype(jnp.float32)
                      ).astype(o_ref.dtype)


# --------------------------------------------------------------------------
# Tile / path planner (pure Python over static shapes)
# --------------------------------------------------------------------------
def _plan(M, H, F, xb, wb, bb, budget):
    """Returns (path, tm, tf, f_pad, estimated_vmem_bytes)."""
    bf16_like = xb <= 2
    if budget >= (80 << 20):          # v5e/v6e-class VMEM
        tm_target = 1024 if bf16_like else 512
    else:                             # v7x-class (64 MiB per core)
        tm_target = 512 if bf16_like else 256
    # >= 2 row tiles whenever possible so v7x's 2 TensorCores both get work.
    tm = max(8, min(tm_target, _round_up(-(-M // 2), 8), _round_up(M, 8)))

    headroom = 2 << 20

    def resident_bytes(tm_):
        b = 4 * tm_ * H * xb                      # x + out, double-buffered
        b += 4 * H * F * wb                       # W1 + W2 (double-buffer alloc)
        b += 2 * (F + H) * bb                     # biases
        b += tm_ * F * 4                          # f32 intermediate
        if wb < 4:
            b += tm_ * F * wb                     # cast copy before 2nd matmul
        return b + headroom

    def tiled_bytes(tm_, tf_):
        b = 4 * tm_ * H * xb
        b += 4 * H * tf_ * wb
        b += 2 * (tf_ + H) * bb
        b += tm_ * H * 4                          # f32 accumulator scratch
        b += tm_ * tf_ * 4                        # f32 intermediate slab
        if wb < 4:
            b += tm_ * tf_ * wb
        return b + headroom

    f_pad = _round_up(F, 128)
    tf_candidates = [t for t in range(min(f_pad, 2048), 0, -128) if f_pad % t == 0]

    while True:
        rb = resident_bytes(tm)
        if rb <= budget:
            return "resident", tm, F, F, rb
        for tf in tf_candidates:
            tb = tiled_bytes(tm, tf)
            if tb <= budget:
                return "tiled", tm, tf, f_pad, tb
        if tm <= 8:
            return "tiled", 8, 128, f_pad, tiled_bytes(8, 128)
        tm = max(8, _round_up(tm // 2, 8))


# --------------------------------------------------------------------------
# Wrapper
# --------------------------------------------------------------------------
@partial(jax.jit, static_argnames=("vmem_budget_override",))
def positionwise_feed_forward(x, w1, b1, w2, b2, vmem_budget_override=None):
    """x: [B,S,H]; w1: [F,H]; b1: [F]; w2: [H,F]; b2: [H] (PyTorch nn.Linear layout)."""
    B, S, H = x.shape
    F = w1.shape[0]
    M = B * S

    budget = _DEFAULT_BUDGET if vmem_budget_override is None else int(vmem_budget_override)
    xb = jnp.dtype(x.dtype).itemsize
    wb = jnp.dtype(w1.dtype).itemsize
    bb = jnp.dtype(b1.dtype).itemsize
    path, tm, tf, f_pad, plan_bytes = _plan(M, H, F, xb, wb, bb, budget)

    x2d = x.reshape(M, H)            # free reshape; no M padding (ragged last
                                     # row tile handled by masked writeback)
    b1_2d = b1.reshape(1, F)
    b2_2d = b2.reshape(1, H)

    vmem_limit = int(min(max(plan_bytes + (8 << 20), 32 << 20),
                         int(_VMEM_CAP_BYTES * 0.9)))
    grid_m = pl.cdiv(M, tm)

    if path == "resident":
        # Full weights stay in VMEM; their block index never changes across the
        # grid, so they are DMA'd from HBM exactly once.
        grid = (grid_m,)
        in_specs = [
            pl.BlockSpec((tm, H), lambda i: (i, 0)),
            pl.BlockSpec((F, H), lambda i: (0, 0)),
            pl.BlockSpec((1, F), lambda i: (0, 0)),
            pl.BlockSpec((H, F), lambda i: (0, 0)),
            pl.BlockSpec((1, H), lambda i: (0, 0)),
        ]
        out_specs = pl.BlockSpec((tm, H), lambda i: (i, 0))
        scratch_shapes = []
        kernel = ffn_kernel_resident
        dim_sem = ("parallel",)
    else:
        # Bounded-VMEM path: stream lane-aligned F slabs and accumulate in f32.
        if f_pad != F:
            # Zero-pad F to a multiple of 128; gelu(0) == 0 so padding is exact.
            # (Only happens for odd F that also doesn't fit weights-resident.)
            w1 = jnp.pad(w1, ((0, f_pad - F), (0, 0)))
            w2 = jnp.pad(w2, ((0, 0), (0, f_pad - F)))
            b1_2d = jnp.pad(b1_2d, ((0, 0), (0, f_pad - F)))
        grid = (grid_m, f_pad // tf)
        in_specs = [
            pl.BlockSpec((tm, H), lambda i, f: (i, 0)),   # x row tile (held over f)
            pl.BlockSpec((tf, H), lambda i, f: (f, 0)),   # W1 row slab  [F,H]
            pl.BlockSpec((1, tf), lambda i, f: (0, f)),   # b1 slab
            pl.BlockSpec((H, tf), lambda i, f: (0, f)),   # W2 column slab [H,F]
            pl.BlockSpec((1, H), lambda i, f: (0, 0)),    # b2
        ]
        out_specs = pl.BlockSpec((tm, H), lambda i, f: (i, 0))
        scratch_shapes = [pltpu.VMEM((tm, H), jnp.float32)]
        kernel = ffn_kernel_tiled
        dim_sem = ("parallel", "arbitrary")

    out2d = pl.pallas_call(
        kernel,
        out_shape=jax.ShapeDtypeStruct((M, H), x.dtype),
        grid_spec=pltpu.PrefetchScalarGridSpec(
            num_scalar_prefetch=0,
            grid=grid,
            in_specs=in_specs,
            out_specs=out_specs,
            scratch_shapes=scratch_shapes,
        ),
        compiler_params=pltpu.CompilerParams(
            dimension_semantics=dim_sem,
            vmem_limit_bytes=vmem_limit,
        ),
    )(x2d, w1, b1_2d, w2, b2_2d)

    return out2d.reshape(B, S, H)


# --------------------------------------------------------------------------
# Reference & helpers
# --------------------------------------------------------------------------
def reference(x, w1, b1, w2, b2):
    inter = jnp.einsum("bsh,fh->bsf", x, w1) + b1
    inter = inter * 0.5 * (1.0 + lax.erf(inter * _INV_SQRT2))
    return jnp.einsum("bsf,hf->bsh", inter, w2) + b2


def _make_params(key, H, F, dtype=jnp.float32):
    kw1, kb1, kw2, kb2 = jax.random.split(key, 4)
    bound1 = 1.0 / math.sqrt(H)
    w1 = jax.random.uniform(kw1, (F, H), dtype, -bound1, bound1)
    b1 = jax.random.uniform(kb1, (F,), dtype, -bound1, bound1)
    bound2 = 1.0 / math.sqrt(F)
    w2 = jax.random.uniform(kw2, (H, F), dtype, -bound2, bound2)
    b2 = jax.random.uniform(kb2, (H,), dtype, -bound2, bound2)
    return w1, b1, w2, b2


if __name__ == "__main__":
    key = jax.random.PRNGKey(0)
    k0, k1, k2, k3 = jax.random.split(key, 4)

    # 1) Small shapes consistent with the module: batch=2, seq=8, hidden=32,
    #    feedforward=64; f32 end-to-end -> exact-erf parity at 1e-5.
    B, S, H, F = 2, 8, 32, 64
    x = jax.random.normal(k0, (B, S, H), dtype=jnp.float32)
    w1, b1, w2, b2 = _make_params(k1, H, F, jnp.float32)
    out = jax.block_until_ready(positionwise_feed_forward(x, w1, b1, w2, b2))
    ref = reference(x, w1, b1, w2, b2)
    assert out.shape == (B, S, H)
    assert jnp.allclose(out, ref, atol=1e-5, rtol=1e-5), "mismatch (small f32)"

    # 2) bf16 inputs/weights: bf16 MXU matmuls with f32 accumulation + f32 GELU
    #    (weights-resident path, >=2 row tiles on the 'parallel' axis).
    B2, S2, H2, F2 = 2, 256, 128, 576
    x_bf = jax.random.normal(k2, (B2, S2, H2), dtype=jnp.float32).astype(jnp.bfloat16)
    pw1, pb1, pw2, pb2 = _make_params(k3, H2, F2, jnp.float32)
    pw1b, pb1b, pw2b, pb2b = (a.astype(jnp.bfloat16) for a in (pw1, pb1, pw2, pb2))
    out_bf = jax.block_until_ready(
        positionwise_feed_forward(x_bf, pw1b, pb1b, pw2b, pb2b))
    ref_bf = reference(x_bf.astype(jnp.float32), pw1b.astype(jnp.float32),
                       pb1b.astype(jnp.float32), pw2b.astype(jnp.float32),
                       pb2b.astype(jnp.float32))
    assert out_bf.shape == (B2, S2, H2)
    assert jnp.allclose(out_bf.astype(jnp.float32), ref_bf, atol=2e-2, rtol=2e-2), \
        "mismatch (bf16 resident)"

    # 3) Force the bounded-VMEM F-tiled path with a small budget override:
    #    exercises the f32 accumulator over F slabs, F padding (576 -> 640,
    #    tf=128) and multiple row tiles, all without any M padding.
    x_f32 = x_bf.astype(jnp.float32)
    out_t = jax.block_until_ready(
        positionwise_feed_forward(x_f32, pw1, pb1, pw2, pb2,
                                  vmem_budget_override=(3 << 20)))
    ref_t = reference(x_f32, pw1, pb1, pw2, pb2)
    assert jnp.allclose(out_t, ref_t, atol=2e-3, rtol=2e-3), "mismatch (tiled f32)"

    print("KERNEL_OK")
</pallas_src>

<mosaic_0001>
module attributes {stable_mosaic.version = 11 : i64} {
  func.func @ffn_kernel_resident(%arg0: i32, %arg1: memref<8x32xf32, #tpu.memory_space<vmem>>, %arg2: memref<64x32xf32, #tpu.memory_space<vmem>>, %arg3: memref<1x64xf32, #tpu.memory_space<vmem>>, %arg4: memref<32x64xf32, #tpu.memory_space<vmem>>, %arg5: memref<1x32xf32, #tpu.memory_space<vmem>>, %arg6: memref<8x32xf32, #tpu.memory_space<vmem>>) attributes {dimension_semantics = [#tpu.dimension_semantics<parallel>], iteration_bounds = array<i64: 2>, scalar_prefetch = 0 : i64, scratch_operands = 0 : i64, tpu.core_type = #tpu.core_type<tc>, window_params = [{transform_indices = @transform_0, window_bounds = array<i64: 8, 32>}, {pipeline_mode = #tpu.pipeline_mode<synchronous>, transform_indices = @transform_1, window_bounds = array<i64: 64, 32>}, {pipeline_mode = #tpu.pipeline_mode<synchronous>, transform_indices = @transform_2, window_bounds = array<i64: 1, 64>}, {pipeline_mode = #tpu.pipeline_mode<synchronous>, transform_indices = @transform_3, window_bounds = array<i64: 32, 64>}, {pipeline_mode = #tpu.pipeline_mode<synchronous>, transform_indices = @transform_4, window_bounds = array<i64: 1, 32>}, {transform_indices = @transform_5, window_bounds = array<i64: 8, 32>}]} {
    %c0 = arith.constant 0 : index
    %c0_0 = arith.constant 0 : index
    %0 = vector.load %arg1[%c0, %c0_0] : memref<8x32xf32, #tpu.memory_space<vmem>>, vector<8x32xf32>
    %c0_1 = arith.constant 0 : index
    %c0_2 = arith.constant 0 : index
    %1 = vector.load %arg2[%c0_1, %c0_2] : memref<64x32xf32, #tpu.memory_space<vmem>>, vector<64x32xf32>
    %cst = arith.constant dense<0.000000e+00> : vector<8x64xf32>
    %2 = tpu.matmul %0, %1, %cst {dimension_numbers = #tpu.dot_dimension_numbers<[1], [1], [0], [0], [0, 0, 1, 0], [], []>} : vector<8x32xf32>, vector<64x32xf32>, vector<8x64xf32> -> vector<8x64xf32>
    %c0_3 = arith.constant 0 : index
    %c0_4 = arith.constant 0 : index
    %3 = vector.load %arg3[%c0_3, %c0_4] : memref<1x64xf32, #tpu.memory_space<vmem>>, vector<1x64xf32>
    %4 = vector.broadcast %3 : vector<1x64xf32> to vector<8x64xf32>
    %5 = arith.addf %2, %4 : vector<8x64xf32>
    %cst_5 = arith.constant 5.000000e-01 : f32
    %6 = vector.broadcast %cst_5 : f32 to vector<8x64xf32>
    %7 = arith.mulf %5, %6 : vector<8x64xf32>
    %cst_6 = arith.constant 0.707106769 : f32
    %8 = vector.broadcast %cst_6 : f32 to vector<8x64xf32>
    %9 = arith.mulf %5, %8 : vector<8x64xf32>
    %10 = math.erf %9 : vector<8x64xf32>
    %cst_7 = arith.constant 1.000000e+00 : f32
    %11 = vector.broadcast %cst_7 : f32 to vector<8x64xf32>
    %12 = arith.addf %11, %10 : vector<8x64xf32>
    %13 = arith.mulf %7, %12 : vector<8x64xf32>
    %c0_8 = arith.constant 0 : index
    %c0_9 = arith.constant 0 : index
    %14 = vector.load %arg4[%c0_8, %c0_9] : memref<32x64xf32, #tpu.memory_space<vmem>>, vector<32x64xf32>
    %cst_10 = arith.constant dense<0.000000e+00> : vector<8x32xf32>
    %15 = tpu.matmul %13, %14, %cst_10 {dimension_numbers = #tpu.dot_dimension_numbers<[1], [1], [0], [0], [0, 0, 1, 0], [], []>} : vector<8x64xf32>, vector<32x64xf32>, vector<8x32xf32> -> vector<8x32xf32>
    %c0_11 = arith.constant 0 : index
    %c0_12 = arith.constant 0 : index
    %16 = vector.load %arg5[%c0_11, %c0_12] : memref<1x32xf32, #tpu.memory_space<vmem>>, vector<1x32xf32>
    %17 = vector.broadcast %16 : vector<1x32xf32> to vector<8x32xf32>
    %18 = arith.addf %15, %17 : vector<8x32xf32>
    %c0_13 = arith.constant 0 : index
    %c0_14 = arith.constant 0 : index
    %19 = vector.load %arg6[%c0_13, %c0_14] : memref<8x32xf32, #tpu.memory_space<vmem>>, vector<8x32xf32>
    tpu.vector_store %arg6[%c0_13, %c0_14], %18 {strides = array<i32>} : memref<8x32xf32, #tpu.memory_space<vmem>>, vector<8x32xf32>,
    return
  }
  func.func @transform_0(%arg0: i32) -> (i32, i32) {
    %c0_i32 = arith.constant 0 : i32
    %c0_i32_0 = arith.constant 0 : i32
    return %arg0, %c0_i32 : i32, i32
  }
  func.func @transform_1(%arg0: i32) -> (i32, i32) {
    %c0_i32 = arith.constant 0 : i32
    %c0_i32_0 = arith.constant 0 : i32
    %c0_i32_1 = arith.constant 0 : i32
    return %c0_i32, %c0_i32_0 : i32, i32
  }
  func.func @transform_2(%arg0: i32) -> (i32, i32) {
    %c0_i32 = arith.constant 0 : i32
    %c0_i32_0 = arith.constant 0 : i32
    %c0_i32_1 = arith.constant 0 : i32
    return %c0_i32, %c0_i32_0 : i32, i32
  }
  func.func @transform_3(%arg0: i32) -> (i32, i32) {
    %c0_i32 = arith.constant 0 : i32
    %c0_i32_0 = arith.constant 0 : i32
    %c0_i32_1 = arith.constant 0 : i32
    return %c0_i32, %c0_i32_0 : i32, i32
  }
  func.func @transform_4(%arg0: i32) -> (i32, i32) {
    %c0_i32 = arith.constant 0 : i32
    %c0_i32_0 = arith.constant 0 : i32
    %c0_i32_1 = arith.constant 0 : i32
    return %c0_i32, %c0_i32_0 : i32, i32
  }
  func.func @transform_5(%arg0: i32) -> (i32, i32) {
    %c0_i32 = arith.constant 0 : i32
    %c0_i32_0 = arith.constant 0 : i32
    return %arg0, %c0_i32 : i32, i32
  }
}

</mosaic_0001>

<bundles_post_ra>
// kernel: positionwise_feed_forward.1
= control target key start
LH: loop header
LB: loop body
LE: loop exit
PB: predicated region body
PF: predicated region fallthrough
CT: control target
= control target key end

     0   :  { %10 = vsyncpa [#allocation3], 0  ;;  %s749_s0 = inlined_call_operand.vmem [shape: f32[16,32], index: 0, kind: input, shape index: {}]   ;;  %s750_s1 = inlined_call_operand.vmem [shape: f32[64,32], index: 1, kind: input, shape index: {}]   ;;  %s751_s2 = inlined_call_operand.vmem [shape: f32[1,64], index: 2, kind: input, shape index: {}]   ;;  %s752_s3 = inlined_call_operand.vmem [shape: f32[32,64], index: 3, kind: input, shape index: {}]   ;;  %s753_s4 = inlined_call_operand.vmem [shape: f32[1,32], index: 4, kind: input, shape index: {}]   ;;  %s754_s5 = inlined_call_operand.hbm [shape: f32[16,32], index: 5, kind: output, shape index: {}]  }
   0x1   :  { %12 = vsyncpa [#allocation3 + $0x1], 0  ;;  %s607_s18 = smov 0   ;;  %s609_s19 = smov 0  }
   0x2   :  { %s611_s20 = smov 0   ;;  %s613_s21 = smov 0  }
   0x3 LB: > { %s628_s22 = sadd.s32 4294967295, %s575_s21   ;;  %s445_s23 = sadd.s32 4294967294, %s575_s21   ;;  %s575_s21 = sphi %s613_s21, %s760_s21   ;;  %s571_s20 = sphi %s611_s20, %s759_s20   ;;  %s567_s19 = sphi %s609_s19, %s758_s19   ;;  %s563_s18 = sphi %s607_s18, %s757_s18  }
   0x4   : > { %s632_s24 = sadd.s32 1, %s575_s21   ;;  %s135_s25 = sadd.s32 1, %s571_s20 }
   0x5   : > { %s132_s26 = ssub.s32 %s575_s21, %s632_s24  ;;  %p145_p0 = scmp.ne.s32.totalorder %s571_s20, %s567_s19 }
   0x6   : > { %p133_p1 = scmp.eq.s32.totalorder %s132_s26, 0  ;;  %p146_p2 = scmp.eq.s32.totalorder %s628_s22, 1 }
   0x7   : > { %p151_p3 = scmp.ne.s32.totalorder %s567_s19, %s563_s18  ;;  %p152_p4 = scmp.eq.s32.totalorder %s445_s23, 1 }
   0x8   : > { %s643_s27 = scalar_select %p133_p1, %s571_s20, %s135_s25  }
   0x9   : > { %p645_p5 = por %p146_p2, %p145_p0  ;;  %p649_p6 = por %p152_p4, %p151_p3 }
   0xa   : > { %p448_p7 = scmp.ge.s32.totalorder %s575_s21, 1  ;;  %p189_p8 = scmp.lt.s32.totalorder %s575_s21, 3 }
   0xc   : > { %p190_p9 = pnand %p448_p7, %p189_p8 }
   0xd   : > { %p216_p10 = scmp.lt.s32.totalorder (!%p190_p9), %s628_s22, 1  ;;  %s467_s6 = sshll.u32 (!%p190_p9), %s628_s22, 3 }
   0xe   : > { %193 = sbr.rel (%p190_p9) target bundleno = 361 (0x169), region = 40  ;;  %s533_s25 = scalar_lea.hbm (!%p190_p9), %s754_s5, 16 }
  0x13   : > { %v228_v0 = vld [vmem:[%s750_s1 + $0x38] sm:$0xff]  ;;  %vm233_vm0 = vcmask 261120   ;;  %v227_v1 = vld [vmem:[%s750_s1 + $0x30] sm:$0xff]  ;;  %v226_v2 = vld [vmem:[%s750_s1 + $0x28] sm:$0xff]  ;;  %s217_s17 = scalar_select %p216_p10, %s628_s22, 1  ;;  %vm333_vm1 = vcmask 523264  }
  0x14   : > { %451 = vmatpush.xpose.msk.msra.mxu0 %vm233_vm0, %v228_v0  ;;  %v225_v3 = vld [vmem:[%s750_s1 + $0x20] sm:$0xff]  ;;  %v224_v4 = vld [vmem:[%s750_s1 + $0x18] sm:$0xff]  ;;  %v223_v5 = vld [vmem:[%s750_s1 + $0x10] sm:$0xff] }
  0x15   : > { %v222_v6 = vld [vmem:[%s750_s1 + $0x8] sm:$0xff]  ;;  %s450_s26 = sshll.u32 %s217_s17, 3  ;;  %v221_v7 = vld [vmem:[%s750_s1] sm:$0xff]  ;;  %v328_v15 = vld [vmem:[%s752_s3 + $0x18] sm:$0xff] }
  0x16   : > { %s219_s9 = scalar_lea.vmem %s749_s0, %s450_s26  ;;  %v509_v9 = vld [vmem:[%s751_s2] ss:$0 sm:$0xff]  ;;  %461 = vmatpush.xpose.msk.msra.mxu1 %vm333_vm1, %v328_v15  ;;  %v327_v20 = vld [vmem:[%s752_s3 + $0x10] sm:$0xff]  ;;  %v326_v23 = vld [vmem:[%s752_s3 + $0x8] sm:$0xff]  ;;  %s213_s26 = sand.u32 1, %s567_s19  }
  0x17   : > { %v220_v8 = vld [vmem:[%s219_s9] sm:$0xff]  ;;  %s449_s30 = sshll.u32 %s213_s26, 3  ;;  %s381_s9 = scalar_lea.hbm %s754_s5, %s467_s6 }
  0x18   : > { %452 = vmatpush.xpose.msk.msra.mxu0 %vm233_vm0, %v227_v1  ;;  %v325_v27 = vld [vmem:[%s752_s3] sm:$0xff]  ;;  %s215_s12 = scalar_lea.vmem [#allocation2], %s449_s30  ;;  %s385_s14 = sshll.u32 %s381_s9, 4  ;;  %s386_s14 = int_to_ptr.hbm [resolvable:$true] %s385_s14 }
  0x19   : > { %v510_v55 = vld [vmem:[%s753_s4] ss:$0 sm:$0xff]  ;;  %s383_s13 = sshll.u32 %s215_s12, 4  ;;  %s371_s15 = scalar_lea.sflag [#allocation3], %s213_s26  ;;  %s384_s13 = int_to_ptr.vmem [resolvable:$true] %s383_s13 }
  0x1a   : > { %462 = vmatpush.xpose.msk.msra.mxu1 %vm333_vm1, %v327_v20  ;;  %s527_s22 = sshra.s32 %s386_s14, 4  ;;  %s528_s22 = int_to_ptr.hbm [resolvable:$true] %s527_s22 }
  0x1b   : > { %s529_s16 = scalar_lea.hbm %s528_s22, 8  ;;  %p534_p0 = scmp.lt.s32.totalorder %s528_s22, %s754_s5 }
  0x1c   : > { %453 = vmatpush.xpose.msk.msra.mxu0 %vm233_vm0, %v226_v2  ;;  %p530_p11 = scmp.ne.s32.totalorder %s528_s22, %s529_s16  ;;  %p535_p1 = scmp.lt.s32.totalorder %s533_s25, %s529_s16 }
  0x1e   : > { %463 = vmatpush.xpose.msk.msra.mxu1 %vm333_vm1, %v326_v23  ;;  %p531_p12 = pnand %p530_p11, %p645_p5  ;;  %p536_p2 = por %p535_p1, %p534_p0 }
  0x20   : > { %454 = vmatpush.xpose.msk.msra.mxu0 %vm233_vm0, %v225_v3  ;;  %p532_p13 = pneg %p531_p12 }
  0x22   : > { %464 = vmatpush.xpose.msk.msra.mxu1 %vm333_vm1, %v325_v27  ;;  %p537_p3 = pnand %p536_p2, %p532_p13 }
  0x24   : > { %455 = vmatpush.xpose.msk.msra.mxu0 %vm233_vm0, %v224_v4 }
  0x28   : > { %456 = vmatpush.xpose.msk.msra.mxu0 %vm233_vm0, %v223_v5 }
  0x2c   : > { %457 = vmatpush.xpose.msk.msra.mxu0 %vm233_vm0, %v222_v6 }
  0x30   : > { %458 = vmatpush.xpose.msk.msra.mxu0 %vm233_vm0, %v221_v7 }
  0x33   : > { %459 = vmatmul.msk.f32.vlgmr.msra.gmra.mxu0 %vm233_vm0, %v220_v8 }
  0xb0   : > { %v278_v10 = vpop.f32.mrf.mxu0 }
  0xb1   : > { %v279_v11 = vadd.f32 %v509_v9, %v278_v10 }
  0xb3   : > { %v282_v12 = vmul.f32 0.70710677, %v279_v11  ;;  %v281_v52 = vmul.f32 0.5, %v279_v11 }
  0xb5   : > { %v283_v13 = vmul.f32 %v282_v12, %v282_v12 }
  0xb7   : > { %v284_v14 = vmin.f32 %v283_v13, 16.0 }
  0xb9   : > { %v285_v16 = vmul.f32 2.1237322e-06, %v284_v14  ;;  %v296_v17 = vmul.f32 3.8918573e-05, %v284_v14 }
  0xbb   : > { %v286_v18 = vadd.f32 0.00028619796, %v285_v16  ;;  %v297_v19 = vadd.f32 0.001143296, %v296_v17 }
  0xbd   : > { %v287_v21 = vmul.f32 %v286_v18, %v284_v14  ;;  %v298_v22 = vmul.f32 %v297_v19, %v284_v14 }
  0xbf   : > { %v299_v24 = vadd.f32 0.014752088, %v298_v22  ;;  %v288_v25 = vadd.f32 0.0036580483, %v287_v21 }
  0xc1   : > { %v300_v26 = vmul.f32 %v299_v24, %v284_v14  ;;  %v289_v29 = vmul.f32 %v288_v25, %v284_v14 }
  0xc3   : > { %v301_v28 = vadd.f32 0.112945676, %v300_v26  ;;  %v290_v32 = vadd.f32 0.05243302, %v289_v29 }
  0xc5   : > { %v302_v30 = vmul.f32 %v301_v28, %v284_v14  ;;  %v291_v35 = vmul.f32 %v290_v32, %v284_v14 }
  0xc7   : > { %v303_v31 = vadd.f32 0.4994258, %v302_v30  ;;  %v292_v36 = vadd.f32 0.18741608, %v291_v35 }
  0xc9   : > { %v304_v33 = vmul.f32 %v303_v31, %v284_v14  ;;  %v293_v38 = vmul.f32 %v292_v36, %v284_v14 }
  0xcb   : > { %v305_v34 = vadd.f32 1.0, %v304_v33  ;;  %v294_v42 = vadd.f32 1.1283791, %v293_v38 }
  0xcd   : > { %511 = vrcp.f32 %v305_v34  ;;  %v317_v41 = vand.u32 2147483648, %v305_v34  ;;  %v315_v44 = vand.u32 2147483647, %v305_v34  ;;  %vm311_vm3 = vweird.f32 %v305_v34 }
  0xce   : > { %v295_v47 = vmul.f32 %v294_v42, %v282_v12 }
  0xcf   : > { %v318_v46 = vor.u32 1.1754944e-38, %v317_v41  ;;  %vm316_vm5 = vcmp.eq.f32.partialorder %v315_v44, 8.507059e+37 }
  0xd3   : > { %v512_v37 = vpop.eup %511 }
  0xd4   : > { %v307_v39 = vmul.f32 %v512_v37, %v305_v34  ;;  %vm312_vm2 = vweird.f32 %v512_v37 }
  0xd5   : > { %vm313_vm4 = vmor %vm311_vm3, %vm312_vm2 }
  0xd6   : > { %v308_v40 = vsub.f32 1.0, %v307_v39 }
  0xd8   : > { %v309_v43 = vmul.f32 %v512_v37, %v308_v40 }
  0xda   : > { %v310_v45 = vadd.f32 %v512_v37, %v309_v43 }
  0xdc   : > { %v314_v48 = vsel %vm313_vm4, %v512_v37, %v310_v45 }
  0xdd   : > { %v319_v49 = vsel %vm316_vm5, %v318_v46, %v314_v48 }
  0xde   : > { %v320_v50 = vmul.f32 %v319_v49, %v295_v47 }
  0xe0   : > { %v460_v51 = vclamps-f32 %v320_v50, 1.0 }
  0xe2   : > { %v323_v53 = vadd.f32 1.0, %v460_v51 }
  0xe4   : > { %v324_v54 = vmul.f32 %v323_v53, %v281_v52 }
  0xe6   : > { %465 = vmatmul.msk.f32.vlgmr.msra.gmra.mxu1 %vm333_vm1, %v324_v54 }
 0x163   : > { %v366_v56 = vpop.f32.mrf.mxu1 }
 0x164   : > { %v367_v57 = vadd.f32 %v510_v55, %v366_v56 }
 0x166   : > { %369 = vst.msk [vmem:[%s215_s12] sm:$0xff] %vm233_vm0, %v367_v57 }
 0x167   : > { %540 = shalt.err (!%p537_p3)
}
 0x168   : > { %470 = dma.vmem_to_hbm [thread:$0]  (%p645_p5), %s384_s13, 128, %s386_s14, %s371_s15  }
 0x169 PF: > { %p476_p4 = scmp.ge.s32.totalorder %s575_s21, 2  ;;  %s397_s26 = sand.u32 1, %s563_s18  }
 0x16a   : > { %s398_s7 = scalar_lea.sflag [#allocation3], %s397_s26 }
 0x16b   : > { %p473_p7 = pnand %p476_p4, %p649_p6 }
 0x16d   : > { %p474_p8 = pneg %p473_p7 }
 0x16f   : > { %558 = dma.done.wait (%p474_p8), %s398_s7, 128  }
 0x170   : > { %560 = vsyncadd (%p474_p8), %s398_s7, 4294967168  ;;  %p15_p9 = scmp.ge.s32.totalorder %s632_s24, 4   ;;  %s757_s18 = smov %s567_s19 }
 0x171   : > { %s758_s19 = smov %s571_s20  ;;  %s759_s20 = smov %s643_s27 }
 0x172   : > { %s760_s21 = smov %s632_s24  ;;  %17 = sbr.rel (!%p15_p9) target bundleno = 3 (0x3), region = 75 }
 0x177   :  { %404 = vsyncpa [#allocation3], 1 }
 0x178   :  { %406 = vsyncpa [#allocation3 + $0x1], 1 }

</bundles_post_ra>
